<compile_context>
chip_gen: v7x
topology: tpu7x:2x2x1
jax: 0.10.0
libtpu: 0.0.40
codegen_flags: <defaults>
</compile_context>

<pallas_src>
import functools

import jax
import jax.numpy as jnp
from jax.experimental import pallas as pl
from jax.experimental.pallas import tpu as pltpu


def _round_up(x, m):
    return ((x + m - 1) // m) * m


def _nmf_kernel_streamed(w_ref, h_ref, o_ref):
    # H column-block streamed per (i, j) step; full-K contraction.
    o_ref[...] = jnp.dot(
        w_ref[...], h_ref[...], preferred_element_type=jnp.float32
    ).astype(o_ref.dtype)


def _nmf_kernel_resident_h(w_ref, h_ref, o_ref, *, tn):
    # Whole H is VMEM-resident; pick this step's column block in-kernel.
    j = pl.program_id(1)
    start = pl.multiple_of(j * tn, 128)
    h_blk = h_ref[:, pl.ds(start, tn)]
    o_ref[...] = jnp.dot(
        w_ref[...], h_blk, preferred_element_type=jnp.float32
    ).astype(o_ref.dtype)


# Keep whole-H residency modest so the (possibly double-buffered) copy plus
# two output buffers stays inside the v7x budget.
_H_RESIDENT_MAX_BYTES = 4 * 1024 * 1024


def _tpu_config():
    """Tile sizes / VMEM budget per TPU generation.

    v5e / v6e (128 MiB VMEM): 32 MiB output tile, 96 MiB scoped limit.
    v7x       (64 MiB VMEM):  16 MiB output tile, 48 MiB scoped limit.
    Falls back to the v7x-safe budget, which is legal on every generation.
    """
    vmem_bytes = None
    try:
        info = pltpu.get_tpu_info()
        vmem_bytes = getattr(info, "vmem_capacity_bytes", None)
    except Exception:
        vmem_bytes = None
    if vmem_bytes is None:
        try:
            kind = jax.devices()[0].device_kind.lower()
        except Exception:
            kind = ""
        if "v5" in kind or "v6" in kind:
            vmem_bytes = 128 * 1024 * 1024
        else:
            vmem_bytes = 64 * 1024 * 1024  # conservative (v7x-like)
    if vmem_bytes >= 100 * 1024 * 1024:
        return 1024, 8192, 96 * 1024 * 1024   # 32 MiB output tile
    return 512, 8192, 48 * 1024 * 1024         # 16 MiB output tile


def nmf_forward(W, H, *, tm=None, tn=None, vmem_limit_bytes=None):
    """Computes W @ H (the NMF reconstruction) with a Pallas TPU kernel.

    W: (M, K) non-negative basis matrix.
    H: (K, N) non-negative code matrix.
    Returns: (M, N) reconstruction, same dtype as W.
    """
    M, K = W.shape
    K2, N = H.shape
    assert K == K2, "inner dims must match"

    d_tm, d_tn, d_vmem = _tpu_config()
    tm = d_tm if tm is None else tm
    tn = d_tn if tn is None else tn
    vmem_limit_bytes = d_vmem if vmem_limit_bytes is None else vmem_limit_bytes

    # Clamp tiles to the problem; keep sublane/lane alignment (tm % 8 == 0,
    # tn % 128 == 0 -> lane-dense, unmasked interior stores).
    tm = max(8, min(tm, _round_up(M, 8)))
    tn = max(128, min(tn, _round_up(N, 128)))

    # Guarantee >=2 grid blocks whenever possible so both v7x TensorCores get
    # work (one extra ~0.35us step is noise on single-TC v5e/v6e).
    if pl.cdiv(M, tm) * pl.cdiv(N, tn) == 1:
        if _round_up(N, 128) >= 256:
            tn = _round_up(pl.cdiv(N, 2), 128)
        elif _round_up(M, 8) >= 16:
            tm = _round_up(pl.cdiv(M, 2), 8)

    grid_m = pl.cdiv(M, tm)
    grid_n = pl.cdiv(N, tn)
    grid = (grid_m, grid_n)  # j (N) innermost -> W tile is never re-DMA'd

    cost = pl.CostEstimate(
        flops=2 * M * N * K,
        transcendentals=0,
        bytes_accessed=W.dtype.itemsize * (M * K + K * N + M * N),
    )

    w_spec = pl.BlockSpec((tm, K), lambda i, j: (i, 0))
    out_spec = pl.BlockSpec((tm, tn), lambda i, j: (i, j))

    h_bytes = K * N * H.dtype.itemsize
    if h_bytes <= _H_RESIDENT_MAX_BYTES:
        # Pin the whole of H in VMEM for the entire grid (constant block index
        # -> fetched once).  Pad its columns to a multiple of tn so the
        # in-kernel pl.ds slice is always in bounds; the zero pad is tiny
        # (K rows) and only feeds output columns >= N, which Pallas masks on
        # writeback, so the result is exact.
        n_res = grid_n * tn
        Hk = H if n_res == N else jnp.pad(H, ((0, 0), (0, n_res - N)))
        h_spec = pl.BlockSpec((K, n_res), lambda i, j: (0, 0))
        kernel = functools.partial(_nmf_kernel_resident_h, tn=tn)
    else:
        # Large H: stream (K, tn) column blocks per grid step.
        Hk = H
        h_spec = pl.BlockSpec((K, tn), lambda i, j: (0, j))
        kernel = _nmf_kernel_streamed

    return pl.pallas_call(
        kernel,
        out_shape=jax.ShapeDtypeStruct((M, N), W.dtype),
        grid_spec=pltpu.PrefetchScalarGridSpec(
            num_scalar_prefetch=0,
            grid=grid,
            in_specs=[w_spec, h_spec],
            out_specs=out_spec,
        ),
        compiler_params=pltpu.CompilerParams(
            dimension_semantics=("parallel", "parallel"),
            vmem_limit_bytes=vmem_limit_bytes,
        ),
        cost_estimate=cost,
    )(W, Hk)


if __name__ == "__main__":
    # Deterministic, non-negative W and H (NMF constraint), small shapes.
    n_components = 15
    M, N = 128, 256

    key = jax.random.PRNGKey(0)
    kw, kh = jax.random.split(key)
    W = jnp.abs(jax.random.normal(kw, (M, n_components), dtype=jnp.float32))
    H = jnp.abs(jax.random.normal(kh, (n_components, N), dtype=jnp.float32))

    out = jax.block_until_ready(nmf_forward(W, H))

    # Cross-check against plain JAX reference of torch.matmul(W, H).
    ref = W @ H
    assert out.shape == (M, N)
    assert jnp.allclose(out, ref, atol=1e-4, rtol=1e-4), "mismatch vs reference"

    # Non-tile-aligned shape: exercises the cdiv grid / masked-edge-tile path.
    M2, N2 = 100, 300
    W2 = jnp.abs(jax.random.normal(kw, (M2, n_components), dtype=jnp.float32))
    H2 = jnp.abs(jax.random.normal(kh, (n_components, N2), dtype=jnp.float32))
    out2 = jax.block_until_ready(nmf_forward(W2, H2))
    assert out2.shape == (M2, N2)
    assert jnp.allclose(out2, W2 @ H2, atol=1e-4, rtol=1e-4), "ragged mismatch"

    print("KERNEL_OK")
</pallas_src>

<mosaic_0001>
module attributes {stable_mosaic.version = 11 : i64} {
  func.func @_nmf_kernel_resident_h(%arg0: i32, %arg1: i32, %arg2: memref<128x15xf32, #tpu.memory_space<vmem>>, %arg3: memref<15x256xf32, #tpu.memory_space<vmem>>, %arg4: memref<128x128xf32, #tpu.memory_space<vmem>>) attributes {dimension_semantics = [#tpu.dimension_semantics<parallel>, #tpu.dimension_semantics<parallel>], iteration_bounds = array<i64: 1, 2>, scalar_prefetch = 0 : i64, scratch_operands = 0 : i64, tpu.core_type = #tpu.core_type<tc>, window_params = [{transform_indices = @transform_0, window_bounds = array<i64: 128, 15>}, {pipeline_mode = #tpu.pipeline_mode<synchronous>, transform_indices = @transform_1, window_bounds = array<i64: 15, 256>}, {transform_indices = @transform_2, window_bounds = array<i64: 128, 128>}]} {
    %c128_i32 = arith.constant 128 : i32
    %0 = arith.muli %arg1, %c128_i32 : i32
    %1 = tpu.assume_multiple %0, 128 : i32
    %c0 = arith.constant 0 : index
    %2 = arith.index_cast %1 : i32 to index
    %3 = vector.load %arg3[%c0, %2] : memref<15x256xf32, #tpu.memory_space<vmem>>, vector<15x128xf32>
    %c0_0 = arith.constant 0 : index
    %c0_1 = arith.constant 0 : index
    %4 = vector.load %arg2[%c0_0, %c0_1] : memref<128x15xf32, #tpu.memory_space<vmem>>, vector<128x15xf32>
    %cst = arith.constant dense<0.000000e+00> : vector<128x128xf32>
    %5 = tpu.matmul %4, %3, %cst {dimension_numbers = #tpu.dot_dimension_numbers<[1], [0], [0], [1], [0, 0, 1, 1], [], []>} : vector<128x15xf32>, vector<15x128xf32>, vector<128x128xf32> -> vector<128x128xf32>
    %c0_2 = arith.constant 0 : index
    %c0_3 = arith.constant 0 : index
    %6 = vector.load %arg4[%c0_2, %c0_3] : memref<128x128xf32, #tpu.memory_space<vmem>>, vector<128x128xf32>
    tpu.vector_store %arg4[%c0_2, %c0_3], %5 {strides = array<i32>} : memref<128x128xf32, #tpu.memory_space<vmem>>, vector<128x128xf32>,
    return
  }
  func.func @transform_0(%arg0: i32, %arg1: i32) -> (i32, i32) {
    %c0_i32 = arith.constant 0 : i32
    %c0_i32_0 = arith.constant 0 : i32
    return %arg0, %c0_i32 : i32, i32
  }
  func.func @transform_1(%arg0: i32, %arg1: i32) -> (i32, i32) {
    %c0_i32 = arith.constant 0 : i32
    %c0_i32_0 = arith.constant 0 : i32
    %c0_i32_1 = arith.constant 0 : i32
    return %c0_i32, %c0_i32_0 : i32, i32
  }
  func.func @transform_2(%arg0: i32, %arg1: i32) -> (i32, i32) {
    %c0_i32 = arith.constant 0 : i32
    return %arg0, %arg1 : i32, i32
  }
}

</mosaic_0001>

<bundles_post_ra>
// kernel: tpu_custom_call.1
= control target key start
LH: loop header
LB: loop body
LE: loop exit
PB: predicated region body
PF: predicated region fallthrough
CT: control target
= control target key end

     0   :  { %7 = vsyncpa [#allocation3], 0  ;;  %s935_s0 = inlined_call_operand.vmem [shape: f32[128,15], index: 0, kind: input, shape index: {}]   ;;  %s936_s1 = inlined_call_operand.vmem [shape: f32[15,256], index: 1, kind: input, shape index: {}]   ;;  %s937_s2 = inlined_call_operand.hbm [shape: f32[128,256], index: 2, kind: output, shape index: {}]  }
   0x1   :  { %9 = vsyncpa [#allocation3 + $0x1], 0  ;;  %s731_s9 = smov 0   ;;  %s733_s10 = smov 0  }
   0x2   :  { %s735_s11 = smov 0   ;;  %s737_s12 = smov 0  }
   0x3   :  { %s739_s13 = smov 0   ;;  %s741_s14 = smov 0  }
   0x4 LB: > { %s489_s15 = sadd.s32 4294967295, %s709_s14   ;;  %s490_s16 = sadd.s32 4294967294, %s709_s14   ;;  %s709_s14 = sphi %s741_s14, %s15_s14   ;;  %s705_s13 = sphi %s739_s13, %s944_s13   ;;  %s701_s12 = sphi %s737_s12, %s943_s12   ;;  %s697_s11 = sphi %s735_s11, %s942_s11   ;;  %s693_s10 = sphi %s733_s10, %s941_s10   ;;  %s689_s9 = sphi %s731_s9, %s940_s9  }
   0x5   : > { %s24_s17 = sadd.s32 1, %s705_s13  ;;  %s83_s18 = sadd.s32 1, %s697_s11 }
   0x6   : > { %p25_p0 = scmp.ge.s32.totalorder %s24_s17, 2  ;;  %p93_p1 = scmp.ne.s32.totalorder %s697_s11, %s693_s10 }
   0x7   : > { %p94_p2 = scmp.eq.s32.totalorder %s489_s15, 1  ;;  %p99_p3 = scmp.ne.s32.totalorder %s693_s10, %s689_s9 }
   0x8   : > { %s946_s17 = smov (%p25_p0, %s24_s17), 0  ;;  %p100_p5 = scmp.eq.s32.totalorder %s490_s16, 1 }
   0x9   : > { %p771_p4 = por %p94_p2, %p93_p1  ;;  %s79_s20 = ssub.s32 %s705_s13, %s946_s17 }
   0xa   : > { %p493_p6 = scmp.ge.s32.totalorder %s709_s14, 1  ;;  %p81_p7 = scmp.eq.s32.totalorder %s79_s20, 0 }
   0xb   : > { %p778_p8 = por %p100_p5, %p99_p3  ;;  %p130_p9 = scmp.lt.s32.totalorder %s709_s14, 3 }
   0xc   : > { %s784_s22 = scalar_select %p81_p7, %s697_s11, %s83_s18  }
   0xd   : > { %p131_p10 = pnand %p493_p6, %p130_p9 }
   0xe   : > { %s495_s23 = sshll.u32 (!%p131_p10), %s701_s12, 7  ;;  %v166_v0 = vld [vmem:[%s935_s0] sm:$0xff] (!%p131_p10)  ;;  %vm182_vm0 = vcmask (!%p131_p10), 121856   ;;  %vm231_vm1 = vcmask (!%p131_p10), 1046528   ;;  %vm711_vm2 = vmmov (!%p131_p10), 1   ;;  %v167_v5 = vld [vmem:[%s935_s0 + $0x8] sm:$0xff] (!%p131_p10) }
   0xf   : > { %134 = sbr.rel (%p131_p10) target bundleno = 266 (0x10a), region = 28  ;;  %v174_v1 = vld [vmem:[%s935_s0 + $0x40] sm:$0xff] (!%p131_p10)  ;;  %s160_s28 = sshra.s32 (!%p131_p10), %s495_s23, 7  ;;  %540 = vmatprep.mubr.msk.f32.mxu0 (!%p131_p10), %vm182_vm0, %v166_v0  ;;  %vm565_vm3 = vmpackc.low (!%p131_p10), %vm231_vm1, %vm711_vm2  ;;  %v175_v6 = vld [vmem:[%s935_s0 + $0x48] sm:$0xff] (!%p131_p10) }
  0x10   : > { %552 = vmatprep.mubr.msk.f32.mxu1 (!%p131_p10), %vm182_vm0, %v174_v1  ;;  %s496_s29 = sshll.u32 (!%p131_p10), %s160_s28, 3  ;;  %v168_v7 = vld [vmem:[%s935_s0 + $0x10] sm:$0xff] (!%p131_p10)  ;;  %v169_v9 = vld [vmem:[%s935_s0 + $0x18] sm:$0xff] (!%p131_p10)  ;;  %v170_v11 = vld [vmem:[%s935_s0 + $0x20] sm:$0xff] (!%p131_p10)  ;;  %s149_s27 = sand.u32 (!%p131_p10), 1, %s693_s10  }
  0x11   : > { %s163_s4 = scalar_lea.vmem (!%p131_p10), %s936_s1, %s496_s29  ;;  %v176_v8 = vld [vmem:[%s935_s0 + $0x50] sm:$0xff] (!%p131_p10)  ;;  %v177_v10 = vld [vmem:[%s935_s0 + $0x58] sm:$0xff] (!%p131_p10)  ;;  %v178_v12 = vld [vmem:[%s935_s0 + $0x60] sm:$0xff] (!%p131_p10)  ;;  %s494_s28 = sshll.u32 (!%p131_p10), %s149_s27, 7 }
  0x12   : > { %v164_v2 = vld [vmem:[%s163_s4] sm:$0xff] (!%p131_p10)  ;;  %v165_v3 = vld [vmem:[%s163_s4 + $0x10] sm:$0x7f] (!%p131_p10)  ;;  %v171_v13 = vld [vmem:[%s935_s0 + $0x28] sm:$0xff] (!%p131_p10)  ;;  %s859_s29 = scalar_lea.vmem (!%p131_p10), [#allocation2], %s494_s28  ;;  %s877_s5 = scalar_lea.hbm (!%p131_p10), %s937_s2, %s495_s23 }
  0x13   : > { %v564_v4 = vpack.c.bf16 (!%p131_p10), %v165_v3, %v164_v2  ;;  %v179_v14 = vld [vmem:[%s935_s0 + $0x68] sm:$0xff] (!%p131_p10)  ;;  %v172_v15 = vld [vmem:[%s935_s0 + $0x30] sm:$0xff] (!%p131_p10)  ;;  %v173_v17 = vld [vmem:[%s935_s0 + $0x38] sm:$0xff] (!%p131_p10)  ;;  %s412_s30 = sshll.u32 (!%p131_p10), %s859_s29, 4  ;;  %s889_s12 = scalar_lea.sflag (!%p131_p10), [#allocation3], %s149_s27  ;;  %s881_s30 = int_to_ptr.vmem [resolvable:$true] %s412_s30 }
  0x14   : > { %v180_v16 = vld [vmem:[%s935_s0 + $0x70] sm:$0xff] (!%p131_p10)  ;;  %v181_v18 = vld [vmem:[%s935_s0 + $0x78] sm:$0xff] (!%p131_p10)  ;;  %s631_s23 = scalar_lea.vmem (!%p131_p10), %s881_s30, 2048  ;;  %s712_s6 = smov (!%p131_p10), [#allocation2]  }
  0x15   : > { %566 = vmatprep.subr.msk.bf16.mxu0 (!%p131_p10), %vm565_vm3, %v564_v4  ;;  %570 = vmatprep.subr.msk.bf16.mxu1 (!%p131_p10), %vm565_vm3, %v564_v4  ;;  %p632_p11 = scmp.ne.s32.totalorder (!%p131_p10), %s881_s30, %s631_s23  ;;  %s635_s7 = sshll.u32 (!%p131_p10), %s712_s6, 4  ;;  %s636_s7 = int_to_ptr.vmem [resolvable:$false] %s635_s7 }
  0x16   : > { %569 = vmatpush3.bf16.msk.msra.mxu0 %vm565_vm3, %v564_v4  ;;  %571 = vmatpush3.bf16.msk.msra.mxu1 %vm565_vm3, %v564_v4  ;;  %s637_s8 = scalar_lea.vmem %s636_s7, 4096  ;;  %p638_p0 = scmp.lt.s32.totalorder %s881_s30, %s636_s7 }
  0x17   : > { %p633_p12 = pnand %p632_p11, %p771_p4  ;;  %p639_p1 = scmp.lt.s32.totalorder %s637_s8, %s631_s23 }
  0x19   : > { %541 = vmatmul.mubr.msk.f32.vlgmr.msra.gmra.mrb[0].mxu0 %vm182_vm0, %v167_v5  ;;  %553 = vmatmul.mubr.msk.f32.vlgmr.msra.gmra.mrb[0].mxu1 %vm182_vm0, %v175_v6  ;;  %p634_p13 = pneg %p633_p12  ;;  %p640_p2 = por %p639_p1, %p638_p0 }
  0x1a   : > { %543 = vmatprep.mubr.msk.f32.mxu0 %vm182_vm0, %v168_v7  ;;  %555 = vmatprep.mubr.msk.f32.mxu1 %vm182_vm0, %v176_v8 }
  0x1b   : > { %p641_p3 = pnand %p640_p2, %p634_p13 }
  0x1d   : > { %544 = vmatmul.mubr.msk.f32.gmra.mrb[2].mxu0 %vm182_vm0, %v169_v9  ;;  %556 = vmatmul.mubr.msk.f32.gmra.mrb[2].mxu1 %vm182_vm0, %v177_v10 }
  0x1e   : > { %546 = vmatprep.mubr.msk.f32.mxu0 %vm182_vm0, %v170_v11  ;;  %558 = vmatprep.mubr.msk.f32.mxu1 %vm182_vm0, %v178_v12 }
  0x21   : > { %547 = vmatmul.mubr.msk.f32.gmra.mrb[4].mxu0 %vm182_vm0, %v171_v13  ;;  %559 = vmatmul.mubr.msk.f32.gmra.mrb[4].mxu1 %vm182_vm0, %v179_v14 }
  0x22   : > { %549 = vmatprep.mubr.msk.f32.mxu0 %vm182_vm0, %v172_v15  ;;  %561 = vmatprep.mubr.msk.f32.mxu1 %vm182_vm0, %v180_v16 }
  0x25   : > { %550 = vmatmul.mubr.msk.f32.gmra.mrb[6].mxu0 %vm182_vm0, %v173_v17  ;;  %562 = vmatmul.mubr.msk.f32.gmra.mrb[6].mxu1 %vm182_vm0, %v181_v18 }
  0xec   : > { %v542_v19 = vpop.f32.mrb[0].mxu0  ;;  %v554_v20 = vpop.f32.mrb[0].mxu1 }
  0xed   : > { %381 = vst [vmem:[%s859_s29 + $0x8] sm:$0xff] %v542_v19  ;;  %389 = vst [vmem:[%s859_s29 + $0x48] sm:$0xff] %v554_v20  ;;  %v301_v21 = vpop.f32.mrb[1].mxu0  ;;  %v341_v22 = vpop.f32.mrb[1].mxu1 }
  0xee   : > { %380 = vst [vmem:[%s859_s29] sm:$0xff] %v301_v21  ;;  %388 = vst [vmem:[%s859_s29 + $0x40] sm:$0xff] %v341_v22 }
  0xf0   : > { %v545_v23 = vpop.f32.mrb[2].mxu0  ;;  %v557_v24 = vpop.f32.mrb[2].mxu1 }
  0xf1   : > { %383 = vst [vmem:[%s859_s29 + $0x18] sm:$0xff] %v545_v23  ;;  %391 = vst [vmem:[%s859_s29 + $0x58] sm:$0xff] %v557_v24  ;;  %v311_v25 = vpop.f32.mrb[3].mxu0  ;;  %v351_v26 = vpop.f32.mrb[3].mxu1 }
  0xf2   : > { %382 = vst [vmem:[%s859_s29 + $0x10] sm:$0xff] %v311_v25  ;;  %390 = vst [vmem:[%s859_s29 + $0x50] sm:$0xff] %v351_v26 }
  0xf4   : > { %v548_v27 = vpop.f32.mrb[4].mxu0  ;;  %v560_v28 = vpop.f32.mrb[4].mxu1 }
  0xf5   : > { %385 = vst [vmem:[%s859_s29 + $0x28] sm:$0xff] %v548_v27  ;;  %393 = vst [vmem:[%s859_s29 + $0x68] sm:$0xff] %v560_v28  ;;  %v321_v29 = vpop.f32.mrb[5].mxu0  ;;  %v361_v30 = vpop.f32.mrb[5].mxu1 }
  0xf6   : > { %384 = vst [vmem:[%s859_s29 + $0x20] sm:$0xff] %v321_v29  ;;  %392 = vst [vmem:[%s859_s29 + $0x60] sm:$0xff] %v361_v30 }
  0xf8   : > { %v551_v31 = vpop.f32.mrb[6].mxu0  ;;  %v563_v32 = vpop.f32.mrb[6].mxu1 }
  0xf9   : > { %387 = vst [vmem:[%s859_s29 + $0x38] sm:$0xff] %v551_v31  ;;  %395 = vst [vmem:[%s859_s29 + $0x78] sm:$0xff] %v563_v32  ;;  %v331_v33 = vpop.f32.mrb[7].mxu0  ;;  %v371_v34 = vpop.f32.mrb[7].mxu1 }
  0xfa   : > { %386 = vst [vmem:[%s859_s29 + $0x30] sm:$0xff] %v331_v33  ;;  %394 = vst [vmem:[%s859_s29 + $0x70] sm:$0xff] %v371_v34 }
  0xfb   : > { %644 = shalt.err (!%p641_p3)
}
  0xfc   : > { %s645_s15 = scalar_lea.hbm %s877_s5, 2048  ;;  %s649_s20 = scalar_lea.hbm %s937_s2, 4096 }
  0xfd   : > { %p646_p5 = scmp.ne.s32.totalorder %s877_s5, %s645_s15  ;;  %p650_p9 = scmp.lt.u32.totalorder %s877_s5, %s937_s2 }
  0xfe   : > { %p651_p10 = scmp.lt.u32.totalorder %s649_s20, %s645_s15  ;;  %p653_p12 = scmp.lt.u32.totalorder %s645_s15, %s877_s5 }
  0xff   : > { %p647_p6 = pnand %p646_p5, %p771_p4 }
 0x100   : > { %p652_p11 = por %p651_p10, %p650_p9 }
 0x101   : > { %p648_p7 = pneg %p647_p6 }
 0x102   : > { %p654_p13 = por %p653_p12, %p652_p11 }
 0x104   : > { %p655_p0 = pnand %p654_p13, %p648_p7 }
 0x106   : > { %658 = shalt.err (!%p655_p0)
}
 0x107   : > { %s713_s26 = smov 128   ;;  %s714_s27 = smov 256  }
 0x108   : > { %s715_s28 = smov 8  }
 0x109   : > { %572 = dma.vmem_to_hbm [thread:$0]  (%p771_p4), %s881_s30, 2048, %s877_s5, %s889_s12, %s713_s26, %s714_s27, %s715_s28  }
 0x10a PF: > { %p578_p1 = scmp.ge.s32.totalorder %s709_s14, 2  ;;  %s427_s29 = sand.u32 1, %s689_s9  }
 0x10b   : > { %s428_s3 = scalar_lea.sflag [#allocation3], %s427_s29 }
 0x10c   : > { %p575_p2 = pnand %p578_p1, %p778_p8 }
 0x10e   : > { %684 = dma.done.wait (!%p575_p2), %s428_s3, 2048  }
 0x10f   : > { %686 = vsyncadd (!%p575_p2), %s428_s3, 4294965248  ;;  %s15_s14 = sadd.s32 1, %s709_s14   ;;  %s940_s9 = smov %s693_s10 }
 0x110   : > { %p12_p3 = scmp.ge.s32.totalorder %s15_s14, 4   ;;  %s941_s10 = smov %s697_s11 }
 0x111   : > { %s942_s11 = smov %s784_s22  ;;  %s943_s12 = smov %s705_s13 }
 0x112   : > { %s944_s13 = smov %s946_s17  ;;  %14 = sbr.rel (!%p12_p3) target bundleno = 4 (0x4), region = 64 }
 0x119   :  { %433 = vsyncpa [#allocation3], 1 }
 0x11a   :  { %435 = vsyncpa [#allocation3 + $0x1], 1 }

</bundles_post_ra>
